<compile_context>
chip_gen: v5e
topology: v5e:2x2
jax: 0.10.0
libtpu: 0.0.40
codegen_flags: <defaults>
</compile_context>

<pallas_src>
import functools

import jax
import jax.numpy as jnp
from jax.experimental import pallas as pl
from jax.experimental.pallas import tpu as pltpu


def _round_up(x, m):
    return ((x + m - 1) // m) * m


def _ganloss_kernel(xc_ref, w_ref, b1_ref, w2t_ref, b2_ref, out_ref, acc_ref,
                    *, true_b):
    # xc_ref : (B_pad, TK)     bf16  current K-slice of [flat_image | cond]
    # w_ref  : (TK, H_pad)     bf16  current K-slice of [W1 ; Wc]
    # b1_ref : (1, H_pad)      f32
    # w2t_ref: (1, H_pad)      f32   W2 transposed (VPU head, not N=1 MXU)
    # b2_ref : (1, 1)          f32
    # out_ref: (1, 1)          f32   softplus(-logits) averaged over true batch
    # acc_ref: (B_pad, H_pad)  f32   VMEM accumulator, resident across K steps
    k = pl.program_id(0)

    @pl.when(k == 0)
    def _init():
        acc_ref[...] = jnp.zeros_like(acc_ref)

    # Streaming GEMM: bf16 operands, f32 accumulation on the MXU.
    acc_ref[...] += jnp.dot(xc_ref[...], w_ref[...],
                            preferred_element_type=jnp.float32)

    @pl.when(k == pl.num_programs(0) - 1)
    def _finalize():
        h = acc_ref[...] + b1_ref[...]
        h = jnp.where(h >= 0.0, h, 0.2 * h)            # LeakyReLU(0.2)
        # Logit head: multiply + cross-lane reduce (VPU/XLU slots) instead of
        # an N=1 MXU matmul with a lane-sparse output.
        logits = jnp.sum(h * w2t_ref[...], axis=-1, keepdims=True)
        logits = logits + b2_ref[...]                  # (B_pad, 1)
        # Numerically stable softplus(-logits):
        #   softplus(z) = max(z, 0) + log(1 + exp(-|z|)),  z = -logits
        z = -logits
        sp = jnp.maximum(z, 0.0) + jnp.log(1.0 + jnp.exp(-jnp.abs(z)))
        # Mask padded batch rows; divide by the TRUE batch size.
        row = jax.lax.broadcasted_iota(jnp.int32, sp.shape, 0)
        sp = jnp.where(row < true_b, sp, 0.0)
        out_ref[...] = jnp.sum(sp, axis=0, keepdims=True) * (1.0 / true_b)


def gan_loss(image, condition, params, *, tk=512):
    """image: (B, C, H, W) NCHW float32; condition: (B, d_cond) float32.

    tk is the K (feature) tile size.  Size it per generation so the
    double-buffered bf16 (B_pad*tk + tk*H_pad) working set stays well inside
    scoped VMEM: ~2048-4096 on v5e (16 MiB default), up to ~8192 on v6e/v7x.
    """
    B, C, H, W = image.shape
    x = image.reshape(B, C * H * W)                    # glue: flatten in JAX
    w1, wc, b1, w2, b2 = params
    d_img, hdim = w1.shape
    d_cond = wc.shape[0]

    # Pad to native TPU granularity: 8 sublanes (batch) x 128 lanes (features).
    b_pad = _round_up(B, 8)
    h_pad = _round_up(hdim, 128)
    c_pad = _round_up(d_cond, 128)
    d_total = d_img + c_pad
    tk = _round_up(tk, 128)
    tk = min(tk, _round_up(d_total, 128))
    d_pad = _round_up(d_total, tk)
    num_k = d_pad // tk

    # Fold image + condition into one operand and [W1 ; Wc] into one weight so
    # the inner loop is a single streaming GEMM (no per-step tiny c@Wc matmul).
    xc = jnp.zeros((b_pad, d_pad), jnp.float32)
    xc = xc.at[:B, :d_img].set(x)
    xc = xc.at[:B, d_img:d_img + d_cond].set(condition)
    w = jnp.zeros((d_pad, h_pad), jnp.float32)
    w = w.at[:d_img, :hdim].set(w1)
    w = w.at[d_img:d_img + d_cond, :hdim].set(wc)

    # bf16 halves HBM bytes on the dominant streamed operands.
    xc = xc.astype(jnp.bfloat16)
    w = w.astype(jnp.bfloat16)

    b1p = jnp.zeros((1, h_pad), jnp.float32).at[:, :hdim].set(b1)
    w2t = jnp.zeros((1, h_pad), jnp.float32).at[:, :hdim].set(w2.reshape(1, hdim))
    b2p = b2.reshape(1, 1).astype(jnp.float32)

    kernel = functools.partial(_ganloss_kernel, true_b=B)

    cost = pl.CostEstimate(
        flops=2 * b_pad * d_pad * h_pad + 4 * b_pad * h_pad,
        transcendentals=2 * b_pad,
        bytes_accessed=(xc.size + w.size) * 2
        + (b1p.size + w2t.size + b2p.size + 1) * 4,
    )

    out = pl.pallas_call(
        kernel,
        out_shape=jax.ShapeDtypeStruct((1, 1), jnp.float32),
        grid_spec=pltpu.PrefetchScalarGridSpec(
            num_scalar_prefetch=0,
            grid=(num_k,),
            in_specs=[
                pl.BlockSpec((b_pad, tk), lambda k: (0, k)),     # [x | c] slice
                pl.BlockSpec((tk, h_pad), lambda k: (k, 0)),     # [W1 ; Wc] slice
                pl.BlockSpec((1, h_pad), lambda k: (0, 0)),      # b1
                pl.BlockSpec((1, h_pad), lambda k: (0, 0)),      # w2^T
                pl.BlockSpec((1, 1), lambda k: (0, 0)),          # b2
            ],
            out_specs=pl.BlockSpec((1, 1), lambda k: (0, 0)),
            scratch_shapes=[pltpu.VMEM((b_pad, h_pad), jnp.float32)],
        ),
        compiler_params=pltpu.CompilerParams(
            dimension_semantics=("arbitrary",)),   # K is a reduction axis
        cost_estimate=cost,
    )(xc, w, b1p, w2t, b2p)

    # loss.mean(0) on a (B, 1) tensor -> shape (1,)
    return out.reshape(1)


def init_params(key, d_img, d_cond, hdim):
    k1, k2, k3 = jax.random.split(key, 3)
    w1 = jax.random.normal(k1, (d_img, hdim), jnp.float32) * 0.02
    wc = jax.random.normal(k2, (d_cond, hdim), jnp.float32) * 0.02
    b1 = jnp.zeros((1, hdim), jnp.float32)
    w2 = jax.random.normal(k3, (hdim, 1), jnp.float32) * 0.02
    b2 = jnp.zeros((1, 1), jnp.float32)
    return (w1, wc, b1, w2, b2)


if __name__ == "__main__":
    key = jax.random.PRNGKey(0)
    k_img, k_cond, k_par = jax.random.split(key, 3)

    B, C, H, W = 2, 4, 16, 16          # small NCHW image batch
    D_COND = 25                        # EG3D-style camera/condition params
    HID = 64

    image = jax.random.normal(k_img, (B, C, H, W), jnp.float32)
    condition = jax.random.normal(k_cond, (B, D_COND), jnp.float32)
    params = init_params(k_par, C * H * W, D_COND, HID)

    # Small tk so the demo exercises the multi-step K reduction.
    loss = gan_loss(image, condition, params, tk=256)
    jax.block_until_ready(loss)

    # Pure-JAX reference of the same synthetic discriminator, using the same
    # bf16 rounding the wrapper applies to the streamed GEMM operands.
    w1, wc, b1, w2, b2 = params
    x = image.reshape(B, -1)
    xb = x.astype(jnp.bfloat16).astype(jnp.float32)
    cb = condition.astype(jnp.bfloat16).astype(jnp.float32)
    w1b = w1.astype(jnp.bfloat16).astype(jnp.float32)
    wcb = wc.astype(jnp.bfloat16).astype(jnp.float32)
    hp = jax.lax.Precision.HIGHEST
    h = (jnp.dot(xb, w1b, precision=hp)
         + jnp.dot(cb, wcb, precision=hp) + b1)
    h = jnp.where(h >= 0.0, h, 0.2 * h)
    logits = jnp.dot(h, w2, precision=hp) + b2
    ref = jax.nn.softplus(-logits).mean(0)
    assert jnp.allclose(loss, ref, atol=1e-4, rtol=1e-4), (loss, ref)

    print("KERNEL_OK")
</pallas_src>

<mosaic_0001>
module attributes {stable_mosaic.version = 11 : i64} {
  func.func @_ganloss_kernel(%arg0: i32, %arg1: memref<8x256xbf16, #tpu.memory_space<vmem>>, %arg2: memref<256x128xbf16, #tpu.memory_space<vmem>>, %arg3: memref<1x128xf32, #tpu.memory_space<vmem>>, %arg4: memref<1x128xf32, #tpu.memory_space<vmem>>, %arg5: memref<1x1xf32, #tpu.memory_space<vmem>>, %arg6: memref<1x1xf32, #tpu.memory_space<vmem>>, %arg7: memref<8x128xf32, #tpu.memory_space<vmem>>) attributes {dimension_semantics = [#tpu.dimension_semantics<arbitrary>], iteration_bounds = array<i64: 5>, scalar_prefetch = 0 : i64, scratch_operands = 1 : i64, tpu.core_type = #tpu.core_type<tc>, window_params = [{transform_indices = @transform_0, window_bounds = array<i64: 8, 256>}, {transform_indices = @transform_1, window_bounds = array<i64: 256, 128>}, {pipeline_mode = #tpu.pipeline_mode<synchronous>, transform_indices = @transform_2, window_bounds = array<i64: 1, 128>}, {pipeline_mode = #tpu.pipeline_mode<synchronous>, transform_indices = @transform_3, window_bounds = array<i64: 1, 128>}, {pipeline_mode = #tpu.pipeline_mode<synchronous>, transform_indices = @transform_4, window_bounds = array<i64: 1, 1>}, {pipeline_mode = #tpu.pipeline_mode<synchronous>, transform_indices = @transform_5, window_bounds = array<i64: 1, 1>}]} {
    %c0_i32 = arith.constant 0 : i32
    %0 = arith.cmpi eq, %arg0, %c0_i32 : i32
    %1 = arith.extui %0 : i1 to i32
    %c0_i32_0 = arith.constant 0 : i32
    %2 = arith.cmpi ne, %1, %c0_i32_0 : i32
    scf.if %2 {
      %cst_9 = arith.constant 0.000000e+00 : f32
      %12 = vector.broadcast %cst_9 : f32 to vector<8x128xf32>
      %c0_10 = arith.constant 0 : index
      %c0_11 = arith.constant 0 : index
      %13 = vector.load %arg7[%c0_10, %c0_11] : memref<8x128xf32, #tpu.memory_space<vmem>>, vector<8x128xf32>
      tpu.vector_store %arg7[%c0_10, %c0_11], %12 {strides = array<i32>} : memref<8x128xf32, #tpu.memory_space<vmem>>, vector<8x128xf32>,
    } else {
    }
    %c0 = arith.constant 0 : index
    %c0_1 = arith.constant 0 : index
    %3 = vector.load %arg7[%c0, %c0_1] : memref<8x128xf32, #tpu.memory_space<vmem>>, vector<8x128xf32>
    %c0_2 = arith.constant 0 : index
    %c0_3 = arith.constant 0 : index
    %4 = vector.load %arg1[%c0_2, %c0_3] : memref<8x256xbf16, #tpu.memory_space<vmem>>, vector<8x256xbf16>
    %c0_4 = arith.constant 0 : index
    %c0_5 = arith.constant 0 : index
    %5 = vector.load %arg2[%c0_4, %c0_5] : memref<256x128xbf16, #tpu.memory_space<vmem>>, vector<256x128xbf16>
    %cst = arith.constant dense<0.000000e+00> : vector<8x128xf32>
    %6 = tpu.matmul %4, %5, %cst {dimension_numbers = #tpu.dot_dimension_numbers<[1], [0], [0], [1], [0, 0, 1, 1], [], []>} : vector<8x256xbf16>, vector<256x128xbf16>, vector<8x128xf32> -> vector<8x128xf32>
    %7 = arith.addf %3, %6 : vector<8x128xf32>
    %c0_6 = arith.constant 0 : index
    %c0_7 = arith.constant 0 : index
    %8 = vector.load %arg7[%c0_6, %c0_7] : memref<8x128xf32, #tpu.memory_space<vmem>>, vector<8x128xf32>
    tpu.vector_store %arg7[%c0_6, %c0_7], %7 {strides = array<i32>} : memref<8x128xf32, #tpu.memory_space<vmem>>, vector<8x128xf32>,
    %c4_i32 = arith.constant 4 : i32
    %9 = arith.cmpi eq, %arg0, %c4_i32 : i32
    %10 = arith.extui %9 : i1 to i32
    %c0_i32_8 = arith.constant 0 : i32
    %11 = arith.cmpi ne, %10, %c0_i32_8 : i32
    scf.if %11 {
      %c0_9 = arith.constant 0 : index
      %c0_10 = arith.constant 0 : index
      %12 = vector.load %arg7[%c0_9, %c0_10] : memref<8x128xf32, #tpu.memory_space<vmem>>, vector<8x128xf32>
      %c0_11 = arith.constant 0 : index
      %c0_12 = arith.constant 0 : index
      %13 = vector.load %arg3[%c0_11, %c0_12] : memref<1x128xf32, #tpu.memory_space<vmem>>, vector<1x128xf32>
      %14 = vector.broadcast %13 : vector<1x128xf32> to vector<8x128xf32>
      %15 = arith.addf %12, %14 : vector<8x128xf32>
      %cst_13 = arith.constant 0.000000e+00 : f32
      %16 = vector.broadcast %cst_13 : f32 to vector<8x128xf32>
      %17 = arith.cmpf oge, %15, %16 : vector<8x128xf32>
      %cst_14 = arith.constant 2.000000e-01 : f32
      %18 = vector.broadcast %cst_14 : f32 to vector<8x128xf32>
      %19 = arith.mulf %18, %15 : vector<8x128xf32>
      %20 = arith.select %17, %15, %19 : vector<8x128xi1>, vector<8x128xf32>
      %c0_15 = arith.constant 0 : index
      %c0_16 = arith.constant 0 : index
      %21 = vector.load %arg4[%c0_15, %c0_16] : memref<1x128xf32, #tpu.memory_space<vmem>>, vector<1x128xf32>
      %22 = vector.broadcast %21 : vector<1x128xf32> to vector<8x128xf32>
      %23 = arith.mulf %20, %22 : vector<8x128xf32>
      %cst_17 = arith.constant dense<0.000000e+00> : vector<8xf32>
      %24 = vector.multi_reduction <add>, %23, %cst_17 [1] : vector<8x128xf32> to vector<8xf32>
      %25 = vector.shape_cast %24 : vector<8xf32> to vector<8x1xf32>
      %c0_18 = arith.constant 0 : index
      %c0_19 = arith.constant 0 : index
      %26 = vector.load %arg5[%c0_18, %c0_19] : memref<1x1xf32, #tpu.memory_space<vmem>>, vector<1x1xf32>
      %27 = vector.broadcast %26 : vector<1x1xf32> to vector<8x1xf32>
      %28 = arith.addf %25, %27 : vector<8x1xf32>
      %cst_20 = arith.constant 0.000000e+00 : f32
      %29 = vector.broadcast %cst_20 : f32 to vector<8x1xf32>
      %30 = arith.subf %29, %28 : vector<8x1xf32>
      %cst_21 = arith.constant 0.000000e+00 : f32
      %31 = vector.broadcast %cst_21 : f32 to vector<8x1xf32>
      %32 = arith.maximumf %30, %31 : vector<8x1xf32>
      %33 = math.absf %30 : vector<8x1xf32>
      %cst_22 = arith.constant 0.000000e+00 : f32
      %34 = vector.broadcast %cst_22 : f32 to vector<8x1xf32>
      %35 = arith.subf %34, %33 : vector<8x1xf32>
      %36 = math.exp %35 : vector<8x1xf32>
      %cst_23 = arith.constant 1.000000e+00 : f32
      %37 = vector.broadcast %cst_23 : f32 to vector<8x1xf32>
      %38 = arith.addf %37, %36 : vector<8x1xf32>
      %39 = math.log %38 : vector<8x1xf32>
      %40 = arith.addf %32, %39 : vector<8x1xf32>
      %41 = tpu.iota {dimensions = array<i32: 0>} : vector<8x1xi32>
      %c2_i32 = arith.constant 2 : i32
      %42 = vector.broadcast %c2_i32 : i32 to vector<8x1xi32>
      %43 = arith.cmpi slt, %41, %42 : vector<8x1xi32>
      %cst_24 = arith.constant 0.000000e+00 : f32
      %44 = vector.broadcast %cst_24 : f32 to vector<8x1xf32>
      %45 = arith.select %43, %40, %44 : vector<8x1xi1>, vector<8x1xf32>
      %cst_25 = arith.constant dense<0.000000e+00> : vector<1xf32>
      %46 = vector.multi_reduction <add>, %45, %cst_25 [0] : vector<8x1xf32> to vector<1xf32>
      %47 = vector.shape_cast %46 : vector<1xf32> to vector<1x1xf32>
      %cst_26 = arith.constant 5.000000e-01 : f32
      %48 = vector.broadcast %cst_26 : f32 to vector<1x1xf32>
      %49 = arith.mulf %47, %48 : vector<1x1xf32>
      %c0_27 = arith.constant 0 : index
      %c0_28 = arith.constant 0 : index
      %50 = vector.load %arg6[%c0_27, %c0_28] : memref<1x1xf32, #tpu.memory_space<vmem>>, vector<1x1xf32>
      tpu.vector_store %arg6[%c0_27, %c0_28], %49 {strides = array<i32>} : memref<1x1xf32, #tpu.memory_space<vmem>>, vector<1x1xf32>,
    } else {
    }
    return
  }
  func.func @transform_0(%arg0: i32) -> (i32, i32) {
    %c0_i32 = arith.constant 0 : i32
    %c0_i32_0 = arith.constant 0 : i32
    return %c0_i32, %arg0 : i32, i32
  }
  func.func @transform_1(%arg0: i32) -> (i32, i32) {
    %c0_i32 = arith.constant 0 : i32
    %c0_i32_0 = arith.constant 0 : i32
    return %arg0, %c0_i32 : i32, i32
  }
  func.func @transform_2(%arg0: i32) -> (i32, i32) {
    %c0_i32 = arith.constant 0 : i32
    %c0_i32_0 = arith.constant 0 : i32
    %c0_i32_1 = arith.constant 0 : i32
    return %c0_i32, %c0_i32_0 : i32, i32
  }
  func.func @transform_3(%arg0: i32) -> (i32, i32) {
    %c0_i32 = arith.constant 0 : i32
    %c0_i32_0 = arith.constant 0 : i32
    %c0_i32_1 = arith.constant 0 : i32
    return %c0_i32, %c0_i32_0 : i32, i32
  }
  func.func @transform_4(%arg0: i32) -> (i32, i32) {
    %c0_i32 = arith.constant 0 : i32
    %c0_i32_0 = arith.constant 0 : i32
    %c0_i32_1 = arith.constant 0 : i32
    return %c0_i32, %c0_i32_0 : i32, i32
  }
  func.func @transform_5(%arg0: i32) -> (i32, i32) {
    %c0_i32 = arith.constant 0 : i32
    %c0_i32_0 = arith.constant 0 : i32
    %c0_i32_1 = arith.constant 0 : i32
    return %c0_i32, %c0_i32_0 : i32, i32
  }
}

</mosaic_0001>

<bundles_post_ra>
// kernel: tpu_custom_call.1
= control target key start
LH: loop header
LB: loop body
LE: loop exit
PB: predicated region body
PF: predicated region fallthrough
CT: control target
= control target key end

     0   :  { %s1065_s0 = inlined_call_operand.hbm [shape: bf16[8,1280], index: 0, kind: input, shape index: {}]   ;;  %s1066_s1 = inlined_call_operand.hbm [shape: bf16[1280,128], index: 1, kind: input, shape index: {}]   ;;  %s1067_s2 = inlined_call_operand.vmem [shape: f32[1,128], index: 2, kind: input, shape index: {}]   ;;  %s1068_s3 = inlined_call_operand.vmem [shape: f32[1,128], index: 3, kind: input, shape index: {}]   ;;  %s1069_s4 = inlined_call_operand.<no memory space> [shape: f32[1,1], index: 4, kind: input, shape index: {}]   ;;  %s1070_s5 = inlined_call_operand.hbm [shape: f32[1,1], index: 5, kind: output, shape index: {}]  }
   0x1   :  { %v10_v0 = vstv %s1069_s4 }
   0x2   :  { %11 = vst [vmem:[#allocation3] sm:$0x1] %v10_v0 }
   0x3   :  { %12 = vsyncpa [#allocation5], 0 }
   0x4   :  { %14 = vsyncpa [#allocation5 + $0x1], 0 }
   0x5   :  { %15 = vsyncpa [#allocation8], 0 }
   0x6   :  { %17 = vsyncpa [#allocation8 + $0x1], 0 }
   0x7   :  { %18 = vsyncpa [#allocation6], 0  ;;  %s909_s20 = smov 0   ;;  %s911_s21 = smov 0  }
   0x8   :  { %s913_s22 = smov 0   ;;  %s915_s23 = smov 0  }
   0x9 LB: > { %s928_s4 = sadd.s32 4294967295, %s870_s23   ;;  %s931_s24 = sadd.s32 1, %s870_s23   ;;  %s870_s23 = sphi %s915_s23, %s1078_s23   ;;  %s866_s22 = sphi %s913_s22, %s1077_s22   ;;  %s862_s21 = sphi %s911_s21, %s1076_s21   ;;  %s858_s20 = sphi %s909_s20, %s1075_s20  }
   0xa   : > { %s28_s25 = ssub.s32 %s870_s23, %s931_s24  ;;  %s31_s26 = sadd.s32 1, %s866_s22 }
   0xb   : > { %p29_p0 = scmp.eq.s32.totalorder %s28_s25, 0  ;;  %p38_p1 = scmp.ne.s32.totalorder %s866_s22, %s862_s21 }
   0xc   : > { %p39_p2 = scmp.eq.s32.totalorder %s870_s23, 0  ;;  %p44_p3 = scmp.ne.s32.totalorder %s862_s21, %s858_s20 }
   0xd   : > { %s941_s27 = scalar_select %p29_p0, %s866_s22, %s31_s26  }
   0xe   : > { %p943_p4 = por %p39_p2, %p38_p1  ;;  %p45_p5 = scmp.eq.s32.totalorder %s928_s4, 0 }
   0xf   : > { %p694_p6 = scmp.lt.s32.totalorder %s870_s23, 5  ;;  %s954_s30 = sand.u32 1, %s866_s22  }
  0x10   : > { %p949_p7 = por %p45_p5, %p44_p3  ;;  %s582_s6 = sshll.u32 %s954_s30, 3 }
  0x11   : > { %s661_s7 = sshll.u32 %s870_s23, 3  ;;  %s191_s11 = scalar_lea.vmem [#allocation4], %s582_s6 }
  0x12   : > { %s196_s10 = scalar_lea.hbm %s1065_s0, %s661_s7  ;;  %s200_s12 = sshll.u32 %s191_s11, 4  ;;  %s201_s12 = int_to_ptr.vmem [resolvable:$true] %s200_s12 }
  0x13   : > { %s198_s13 = sshll.u32 %s196_s10, 4  ;;  %p963_p8 = pnand %p694_p6, %p943_p4  ;;  %s199_s13 = int_to_ptr.hbm [resolvable:$true] %s198_s13 }
  0x14   : > { %p588_p9 = scmp.ge.s32.totalorder %s870_s23, 1  ;;  %p227_p10 = scmp.lt.s32.totalorder %s870_s23, 6 }
  0x15   : > { %s188_s15 = scalar_lea.sflag [#allocation5], %s954_s30  ;;  %s740_s16 = sshra.s32 %s199_s13, 4  ;;  %s741_s16 = int_to_ptr.hbm [resolvable:$true] %s740_s16 }
  0x16   : > { %s742_s17 = scalar_lea.hbm %s741_s16, 8  ;;  %p744_p12 = pneg %p963_p8 }
  0x17   : > { %p743_p11 = scmp.ne.s32.totalorder %s741_s16, %s742_s17  ;;  %s747_s20 = scalar_lea.hbm %s1065_s0, 40 }
  0x18   : > { %p748_p1 = scmp.lt.s32.totalorder %s741_s16, %s1065_s0  ;;  %p749_p2 = scmp.lt.s32.totalorder %s747_s20, %s742_s17 }
  0x19   : > { %p745_p13 = pnand %p744_p12, %p743_p11 }
  0x1a   : > { %p750_p3 = por %p749_p2, %p748_p1 }
  0x1b   : > { %p746_p0 = pneg %p745_p13 }
  0x1d   : > { %p751_p4 = pnand %p750_p3, %p746_p0 }
  0x1f   : > { %754 = shalt.err (!%p751_p4)
}
  0x20   : > { %690 = dma.hbm_to_vmem [thread:$0]  (!%p963_p8), %s199_s13, 128, %s201_s12, %s188_s15  }
  0x21   : > { %p987_p5 = pnand %p588_p9, %p227_p10  ;;  %s585_s6 = sshll.u32 %s954_s30, 7 }
  0x22   : > { %s662_s7 = sshll.u32 %s870_s23, 7  ;;  %s211_s11 = scalar_lea.vmem [#allocation7], %s585_s6 }
  0x23   : > { %s216_s10 = scalar_lea.hbm %s1066_s1, %s662_s7  ;;  %s219_s16 = sshll.u32 %s211_s11, 4  ;;  %s220_s16 = int_to_ptr.vmem [resolvable:$true] %s219_s16 }
  0x24   : > { %s217_s17 = sshll.u32 %s216_s10, 4  ;;  %s208_s18 = scalar_lea.sflag [#allocation8], %s954_s30  ;;  %s218_s17 = int_to_ptr.hbm [resolvable:$true] %s217_s17 }
  0x25   : > { %s770_s19 = sshra.s32 %s218_s17, 4  ;;  %s777_s15 = scalar_lea.hbm %s1066_s1, 640  ;;  %s771_s19 = int_to_ptr.hbm [resolvable:$true] %s770_s19 }
  0x26   : > { %s772_s12 = scalar_lea.hbm %s771_s19, 128  ;;  %p778_p11 = scmp.lt.s32.totalorder %s771_s19, %s1066_s1 }
  0x27   : > { %p773_p6 = scmp.ne.s32.totalorder %s771_s19, %s772_s12  ;;  %p779_p13 = scmp.lt.s32.totalorder %s777_s15, %s772_s12 }
  0x29   : > { %p775_p9 = pnand %p773_p6, %p744_p12  ;;  %p780_p0 = por %p779_p13, %p778_p11 }
  0x2b   : > { %p776_p10 = pneg %p775_p9 }
  0x2d   : > { %p781_p1 = pnand %p780_p0, %p776_p10 }
  0x2f   : > { %784 = shalt.err (!%p781_p1)
}
  0x30   : > { %s872_s30 = smov 64   ;;  %s873_s26 = smov 4  }
  0x31   : > { %693 = dma.hbm_to_vmem [thread:$0]  (!%p963_p8), %s218_s17, 2048, %s220_s16, %s208_s18, %s872_s30, %s872_s30, %s873_s26  }
  0x32   : > { %231 = sbr.rel (%p987_p5) target bundleno = 414 (0x19e), region = 40  ;;  %s233_s6 = sand.u32 (!%p987_p5), 1, %s862_s21  }
  0x33   : > { %s589_s7 = sshll.u32 (!%p987_p5), %s233_s6, 3  ;;  %s234_s8 = scalar_lea.sflag (!%p987_p5), [#allocation5], %s233_s6 }
  0x34   : > { %s1011_s9 = scalar_lea.vmem (!%p987_p5), [#allocation4], %s589_s7 }
  0x37   : > { %845 = dma.done.wait (%p949_p7), %s234_s8, 128  }
  0x38   : > { %847 = vsyncadd (%p949_p7), %s234_s8, 4294967168  ;;  %s590_s10 = sshll.u32 %s233_s6, 7  ;;  %s244_s11 = scalar_lea.sflag [#allocation8], %s233_s6 }
  0x39   : > { %s1017_s14 = scalar_lea.vmem [#allocation7], %s590_s10 }
  0x3a   : > { %849 = dma.done.wait (%p949_p7), %s244_s11, 2048  }
  0x3b   : > { %851 = vsyncadd (%p949_p7), %s244_s11, 4294965248  ;;  %p591_p8 = scmp.ne.s32.totalorder %s928_s4, 0 }
  0x3d   : > { %280 = sbr.rel (%p591_p8) target bundleno = 68 (0x44), region = 52 }
  0x42   : > { %v874_v1 = vmov 0.0  }
  0x43   : > { %281 = vst [vmem:[#allocation2] sm:$0xff] %v874_v1 }
  0x44 PF: > { %v670_v2 = vld [vmem:[%s1017_s14 + $0x38] sm:$0xff]  ;;  %v669_v4 = vld [vmem:[%s1017_s14 + $0x30] sm:$0xff]  ;;  %v668_v6 = vld [vmem:[%s1017_s14 + $0x28] sm:$0xff]  ;;  %p656_p7 = scmp.ne.s32.totalorder %s928_s4, 4 }
  0x45   : > { %v678_v3 = vld [vmem:[%s1017_s14 + $0x78] sm:$0xff]  ;;  %419 = vmatpush.bf16.msra.mxu0 %v670_v2  ;;  %v677_v5 = vld [vmem:[%s1017_s14 + $0x70] sm:$0xff]  ;;  %v676_v7 = vld [vmem:[%s1017_s14 + $0x68] sm:$0xff] }
  0x46   : > { %432 = vmatpush.bf16.msra.mxu1 %v678_v3  ;;  %v667_v8 = vld [vmem:[%s1017_s14 + $0x20] sm:$0xff]  ;;  %v666_v10 = vld [vmem:[%s1017_s14 + $0x18] sm:$0xff]  ;;  %v665_v12 = vld [vmem:[%s1017_s14 + $0x10] sm:$0xff] }
  0x47   : > { %v675_v9 = vld [vmem:[%s1017_s14 + $0x60] sm:$0xff]  ;;  %v674_v11 = vld [vmem:[%s1017_s14 + $0x58] sm:$0xff]  ;;  %v673_v13 = vld [vmem:[%s1017_s14 + $0x50] sm:$0xff] }
  0x48   : > { %v664_v14 = vld [vmem:[%s1017_s14 + $0x8] sm:$0xff]  ;;  %v283_v16 = vld [vmem:[%s1011_s9] sm:$0xff]  ;;  %v663_v19 = vld [vmem:[%s1017_s14] sm:$0xff] }
  0x49   : > { %420 = vmatpush.bf16.msra.mxu0 %v669_v4  ;;  %v672_v15 = vld [vmem:[%s1017_s14 + $0x48] sm:$0xff]  ;;  %v317_v17 = vunpack.c.l.b16 %v283_v16  ;;  %v318_v18 = vunpack.c.h.b16 %v283_v16  ;;  %v671_v20 = vld [vmem:[%s1017_s14 + $0x40] sm:$0xff] }
  0x4a   : > { %433 = vmatpush.bf16.msra.mxu1 %v677_v5  ;;  %v282_v24 = vld [vmem:[#allocation2] sm:$0xff] }
  0x4b   : > { %v319_v21 = vpack.c.b16 %v317_v17, %v317_v17  ;;  %v320_v22 = vpack.c.b16 %v318_v18, %v318_v18 }
  0x4d   : > { %421 = vmatpush.bf16.msra.mxu0 %v668_v6 }
  0x4e   : > { %434 = vmatpush.bf16.msra.mxu1 %v676_v7 }
  0x51   : > { %422 = vmatpush.bf16.msra.mxu0 %v667_v8 }
  0x52   : > { %435 = vmatpush.bf16.msra.mxu1 %v675_v9 }
  0x55   : > { %423 = vmatpush.bf16.msra.mxu0 %v666_v10 }
  0x56   : > { %436 = vmatpush.bf16.msra.mxu1 %v674_v11 }
  0x59   : > { %424 = vmatpush.bf16.msra.mxu0 %v665_v12 }
  0x5a   : > { %437 = vmatpush.bf16.msra.mxu1 %v673_v13 }
  0x5d   : > { %425 = vmatpush.bf16.msra.mxu0 %v664_v14 }
  0x5e   : > { %438 = vmatpush.bf16.msra.mxu1 %v672_v15 }
  0x61   : > { %426 = vmatpush.bf16.msra.mxu0 %v663_v19 }
  0x62   : > { %439 = vmatpush.bf16.msra.mxu1 %v671_v20 }
  0x64   : > { %427 = vmatmul.bf16.vlgmr.msra.gmra.mxu0 %v319_v21 }
  0x65   : > { %440 = vmatmul.bf16.vlgmr.msra.gmra.mxu1 %v320_v22 }
  0xe1   : > { %v428_v23 = vpop.f32.mrf.mxu0 }
  0xe2   : > { %v441_v25 = vpop.f32.mrf.mxu1 }
  0xe3   : > { %v442_v26 = vadd.f32 %v441_v25, %v428_v23 }
  0xe5   : > { %v445_v27 = vadd.f32 %v442_v26, %v282_v24 }
  0xe6   : > { %450 = sbr.rel (%p656_p7) target bundleno = 409 (0x199), region = 56 }
  0xe7   : > { %446 = vst [vmem:[#allocation2] sm:$0xff] %v445_v27 }
  0xe9   : > { %v430_v28 = vpop.f32.mrf.mxu0 }
  0xea   : > { %v443_v29 = vpop.f32.mrf.mxu1 }
  0xeb   : > { %v733_v31 = vld [vmem:[%s1067_s2] ss:$0 sm:$0xff]  ;;  %v735_v37 = vld [vmem:[#allocation3] ss:$0 sm:$0xff]  ;;  %v482_v46 = vlaneseq  ;;  %vm486_vm2 = vcmask 7168   ;;  %vm495_vm3 = vcmask 0  }
  0xec   : > { %v734_v33 = vld [vmem:[%s1068_s3] ss:$0 sm:$0xff] }
  0xed   : > { %v483_v47 = vshrl.u32 %v482_v46, 7 }
  0xee   : > { %v451_v30 = vld [vmem:[#allocation2] sm:$0xff] }
  0xef   : > { %v456_v32 = vadd.f32 %v733_v31, %v451_v30  ;;  %vm484_vm1 = vcmp.lt.s32.totalorder %v483_v47, 2 }
  0xf1   : > { %vm457_vm0 = vcmp.ge.f32.partialorder %v456_v32, 0.0  ;;  %v458_v34 = vmul.f32 0.2, %v456_v32 }
  0xf3   : > { %v459_v35 = vsel %vm457_vm0, %v456_v32, %v458_v34 }
  0xf4   : > { %v464_v36 = vmul.f32 %v734_v33, %v459_v35 }
  0xf6   : > { %465 = vadd.xlane.f32.xlu0 %v464_v36 }
 0x169   : > { %v466_v38 = vpop.xlane.xlu0 %465 }
 0x16a   : > { %v471_v39 = vadd.f32 %v735_v37, %v466_v38 }
 0x16c   : > { %v472_v40 = vsub.f32 0.0, %v471_v39 }
 0x16e   : > { %v474_v41 = vand.u32 2147483647, %v472_v40  ;;  %v473_v49 = vmax.f32 %v472_v40, 0.0 }
 0x170   : > { %v475_v42 = vsub.f32 0.0, %v474_v41 }
 0x172   : > { %v476_v43 = vmul.f32 1.442695, %v475_v42 }
 0x174   : > { %736 = vpow2.f32 %v476_v43 }
 0x17a   : > { %v737_v44 = vpop.eup %736 }
 0x17b   : > { %v478_v45 = vadd.f32 1.0, %v737_v44 }
 0x17d   : > { %738 = vlog2.f32 %v478_v45 }
 0x183   : > { %v739_v48 = vpop.eup %738 }
 0x184   : > { %v480_v50 = vmul.f32 0.6931472, %v739_v48 }
 0x186   : > { %v481_v51 = vadd.f32 %v480_v50, %v473_v49 }
 0x188   : > { %v485_v52 = vsel %vm484_vm1, %v481_v51, 0.0 }
 0x189   : > { %v487_v53 = vsel %vm486_vm2, %v485_v52, 0.0 }
 0x18a   : > { %v488_v54 = vrot.slane %v487_v53, 4 }
 0x18c   : > { %v489_v55 = vadd.f32 %v488_v54, %v487_v53 }
 0x18e   : > { %v490_v56 = vrot.slane %v489_v55, 2 }
 0x190   : > { %v491_v57 = vadd.f32 %v490_v56, %v489_v55 }
 0x192   : > { %v492_v58 = vrot.slane %v491_v57, 1 }
 0x194   : > { %v493_v59 = vadd.f32 %v492_v58, %v491_v57 }
 0x196   : > { %v494_v60 = vmul.f32 0.5, %v493_v59 }
 0x198   : > { %496 = vst.msk [vmem:[#allocation9] sm:$0x1] %vm495_vm3, %v494_v60 }
 0x199 PF: > { %p695_p12 = scmp.eq.s32.totalorder %s928_s4, 4  ;;  %s875_s18 = smov [#allocation9]  }
 0x19a   : > { %s503_s19 = sshll.u32 %s875_s18, 4  ;;  %s505_s23 = sshll.u32 %s1070_s5, 4  ;;  %s504_s19 = int_to_ptr.vmem [resolvable:$true] %s503_s19  ;;  %s506_s23 = int_to_ptr.hbm [resolvable:$true] %s505_s23 }
 0x19b   : > { %684 = dma.vmem_to_hbm [thread:$0]  (%p695_p12), %s504_s19, 16, %s506_s23, [#allocation6]  }
 0x19c   : > { %853 = dma.done.wait (%p695_p12), [#allocation6], 16  }
 0x19d   : > { %855 = vsyncadd (%p695_p12), [#allocation6], 4294967280 }
 0x19e PF: > { %p21_p2 = scmp.ge.s32.totalorder %s931_s24, 7   ;;  %s1075_s20 = smov %s862_s21 }
 0x19f   : > { %s1076_s21 = smov %s866_s22  ;;  %s1077_s22 = smov %s941_s27 }
 0x1a0   : > { %s1078_s23 = smov %s931_s24  ;;  %23 = sbr.rel (!%p21_p2) target bundleno = 9 (0x9), region = 98 }
 0x1a5   :  { %519 = vsyncpa [#allocation5], 1 }
 0x1a6   :  { %521 = vsyncpa [#allocation5 + $0x1], 1 }
 0x1a7   :  { %522 = vsyncpa [#allocation8], 1 }
 0x1a8   :  { %524 = vsyncpa [#allocation8 + $0x1], 1 }
 0x1a9   :  { %525 = vsyncpa [#allocation6], 1 }
 0x1aa   :  { %527 = vsyncpa [#allocation6 + $0x1], 1 }

</bundles_post_ra>
